<compile_context>
chip_gen: v5e
topology: v5e:2x2
jax: 0.10.0
libtpu: 0.0.40
codegen_flags: <defaults>
</compile_context>

<pallas_src>
import jax
import jax.numpy as jnp
from jax.experimental import pallas as pl
from jax.experimental.pallas import tpu as pltpu

_LANES = 128
_VMEM_TILE_BUDGET = 40 * 1024 * 1024   # cap for the double-buffered input blocks
_VMEM_LIMIT = 48 * 1024 * 1024         # scoped VMEM limit (safe on v5e/v6e/v7x)


def _ce_partial_kernel(logits_ref, labels_ref, out_ref):
    # logits_ref: (3, Rt, 128)  native dtype (f32 / bf16), batch dense over (sublane, lane)
    # labels_ref: (1, Rt, 128)  int8, -1 marks padding / ragged lanes
    # out_ref:    (1, 1, 128)   f32 per-lane partial sums for this tile
    r0 = logits_ref[0].astype(jnp.float32)          # (Rt, 128)
    r1 = logits_ref[1].astype(jnp.float32)
    r2 = logits_ref[2].astype(jnp.float32)
    lab = labels_ref[0].astype(jnp.int32)           # (Rt, 128)

    # Numerically stable 3-class log-sum-exp: pure elementwise VPU + EUP work on
    # fully dense vregs (no per-example cross-lane reduce).
    m = jnp.maximum(jnp.maximum(r0, r1), r2)
    sumexp = jnp.exp(r0 - m) + jnp.exp(r1 - m) + jnp.exp(r2 - m)
    lse = jnp.log(sumexp) + m

    # logits[label] via a 2-deep select chain (labels in {0,1,2}; -1 = padding).
    picked = jnp.where(lab == 0, r0, jnp.where(lab == 1, r1, r2))

    # Select (not multiply) so garbage in out-of-bounds lanes can never become NaN.
    per_example = jnp.where(lab >= 0, lse - picked, 0.0)

    # One sublane (XLU) reduce per tile; lane reduce happens in the wrapper.
    out_ref[...] = jnp.sum(per_example, axis=0, keepdims=True).reshape(1, 1, _LANES)


def _ce_sum_ref(logits_bc, labels):
    """Pure-jnp path (tiny batches / ragged tails): logits (N, 3), labels (N,) -> f32 sum."""
    logp = jax.nn.log_softmax(logits_bc.astype(jnp.float32), axis=-1)
    picked = jnp.take_along_axis(logp, labels.astype(jnp.int32)[:, None], axis=-1)[:, 0]
    return -jnp.sum(picked)


def _cross_entropy_sum_pallas(logits_cm, labels, *, tile_rows):
    """Sum of cross-entropy terms. logits_cm: (3, B_main), B_main % 128 == 0, B_main > 0."""
    c, b_main = logits_cm.shape
    assert c == 3 and b_main > 0 and b_main % _LANES == 0
    rows = b_main // _LANES
    dt_bytes = jnp.dtype(logits_cm.dtype).itemsize

    # Tile sizing: dense (Rt, 128) rows, clamped so the double-buffered footprint
    # stays inside scoped VMEM on every generation.
    bytes_per_row = (3 * dt_bytes + 1) * _LANES          # 3 logit planes + int8 label
    max_rows = max(32, (_VMEM_TILE_BUDGET // (2 * bytes_per_row)) // 32 * 32)
    rt = min(int(tile_rows), max_rows)
    if rows <= rt:
        rt = rows                                        # single full-extent tile
        num_tiles = 1
    else:
        rt = max(32, (rt // 32) * 32)                    # aligned for f32/bf16/int8 blocks
        num_tiles = pl.cdiv(rows, rt)

    # Labels: int8, padded (tiny) to the tile grid with the -1 sentinel, tiled densely.
    lab = labels.astype(jnp.int8)
    pad = num_tiles * rt * _LANES - b_main
    if pad:
        lab = jnp.pad(lab, (0, pad), constant_values=-1)
    lab = lab.reshape(num_tiles, rt, _LANES)

    # Free (contiguous, dim-splitting) reshape; logits are NOT padded in HBM. The
    # ragged last tile reads undefined lanes which the label mask discards in-kernel.
    logits3 = logits_cm.reshape(3, rows, _LANES)

    cost = pl.CostEstimate(
        flops=12 * b_main,
        transcendentals=4 * b_main,
        bytes_accessed=3 * b_main * dt_bytes + num_tiles * rt * _LANES + num_tiles * _LANES * 4,
    )

    partials = pl.pallas_call(
        _ce_partial_kernel,
        out_shape=jax.ShapeDtypeStruct((num_tiles, 1, _LANES), jnp.float32),
        grid_spec=pltpu.PrefetchScalarGridSpec(
            num_scalar_prefetch=0,
            grid=(num_tiles,),
            in_specs=[
                pl.BlockSpec((3, rt, _LANES), lambda i: (0, i, 0)),
                pl.BlockSpec((1, rt, _LANES), lambda i: (i, 0, 0)),
            ],
            out_specs=pl.BlockSpec((1, 1, _LANES), lambda i: (i, 0, 0)),
        ),
        compiler_params=pltpu.CompilerParams(
            dimension_semantics=("parallel",),   # independent tiles -> v7x megacore
            vmem_limit_bytes=_VMEM_LIMIT,
        ),
        cost_estimate=cost,
    )(logits3, lab)
    return jnp.sum(partials)


def custom_trading_loss_class_major(logits_cm, true_labels, *, tile_rows=8192):
    """Loss from class-major logits (3, B) -- no wrapper transpose / no logits pad."""
    c, b = logits_cm.shape
    if c != 3:
        raise ValueError("CustomTradingLoss expects 3 classes (sell/hold/buy)")
    if b < _LANES:
        return _ce_sum_ref(jnp.transpose(logits_cm), true_labels) / jnp.float32(b)
    b_main = (b // _LANES) * _LANES
    # NOTE: when b % 128 != 0 the [:, :b_main] slice costs one copy of the main part;
    # producers should prefer batch sizes that are multiples of 128.
    main = logits_cm if b_main == b else logits_cm[:, :b_main]
    total = _cross_entropy_sum_pallas(main, true_labels[:b_main], tile_rows=tile_rows)
    if b_main < b:
        total = total + _ce_sum_ref(jnp.transpose(logits_cm[:, b_main:]), true_labels[b_main:])
    return total / jnp.float32(b)


def custom_trading_loss(probabilities, true_labels, *, tile_rows=8192, min_kernel_batch=32768):
    """Spec-compatible entry. probabilities: (B, 3) float, true_labels: (B,) int -> scalar f32."""
    b, c = probabilities.shape
    if c != 3:
        raise ValueError("CustomTradingLoss expects 3 classes (sell/hold/buy)")
    if b < max(int(min_kernel_batch), _LANES):
        # Tiny batches: pallas_call launch / pipeline cost dominates -> pure jnp.
        return _ce_sum_ref(probabilities, true_labels) / jnp.float32(b)

    b_main = (b // _LANES) * _LANES
    # Single unavoidable transpose to class-major given the (B, 3) spec interface.
    # TODO(synk): producers that can emit class-major (3, B) logits should call
    # custom_trading_loss_class_major and skip this HBM pass entirely.
    logits_cm = jnp.transpose(probabilities[:b_main])
    total = _cross_entropy_sum_pallas(logits_cm, true_labels[:b_main], tile_rows=tile_rows)
    if b_main < b:
        total = total + _ce_sum_ref(probabilities[b_main:], true_labels[b_main:])
    return total / jnp.float32(b)


if __name__ == "__main__":
    key = jax.random.PRNGKey(0)

    def _ref_loss(probs, labs):
        lp = jax.nn.log_softmax(probs.astype(jnp.float32), axis=-1)
        return -jnp.mean(lp[jnp.arange(probs.shape[0]), labs])

    def _check(loss, probs, labs, name):
        ref = _ref_loss(probs, labs)
        assert jnp.allclose(loss, ref, atol=1e-5, rtol=1e-4), (name, float(loss), float(ref))

    # 1) spec-shaped tiny batch -> small-B fast path (pure jnp, no kernel launch)
    k1, k2, key = jax.random.split(key, 3)
    p1 = jax.random.normal(k1, (8, 3), jnp.float32)
    l1 = jax.random.randint(k2, (8,), 0, 3, jnp.int32)
    loss1 = custom_trading_loss(p1, l1)
    jax.block_until_ready(loss1)
    _check(loss1, p1, l1, "fast-path")

    # 2) forced kernel path, multi-tile (2 tiles), aligned batch, parallel grid axis
    k1, k2, key = jax.random.split(key, 3)
    p2 = jax.random.normal(k1, (8192, 3), jnp.float32)
    l2 = jax.random.randint(k2, (8192,), 0, 3, jnp.int32)
    loss2 = custom_trading_loss(p2, l2, tile_rows=32, min_kernel_batch=0)
    jax.block_until_ready(loss2)
    _check(loss2, p2, l2, "kernel-multitile")

    # 3) ragged batch: 256 elems via kernel (single full-extent tile) + 44-elem jnp tail
    k1, k2, key = jax.random.split(key, 3)
    p3 = jax.random.normal(k1, (300, 3), jnp.float32)
    l3 = jax.random.randint(k2, (300,), 0, 3, jnp.int32)
    loss3 = custom_trading_loss(p3, l3, min_kernel_batch=0)
    jax.block_until_ready(loss3)
    _check(loss3, p3, l3, "kernel-ragged-tail")

    # 4) ragged LAST TILE: exercises the un-padded-logits OOB + label-mask path
    k1, k2, key = jax.random.split(key, 3)
    b4 = 37 * 128            # R=37, Rt=32 -> 2 tiles, second tile only 5/32 rows valid
    p4 = jax.random.normal(k1, (b4, 3), jnp.float32)
    l4 = jax.random.randint(k2, (b4,), 0, 3, jnp.int32)
    loss4 = custom_trading_loss(p4, l4, tile_rows=32, min_kernel_batch=0)
    jax.block_until_ready(loss4)
    _check(loss4, p4, l4, "kernel-oob-mask")

    # 5) class-major entry point (producer already supplies (3, B) -> no wrapper transpose)
    k1, k2, key = jax.random.split(key, 3)
    p5 = jax.random.normal(k1, (256, 3), jnp.float32)
    l5 = jax.random.randint(k2, (256,), 0, 3, jnp.int32)
    loss5 = custom_trading_loss_class_major(jnp.transpose(p5), l5)
    jax.block_until_ready(loss5)
    _check(loss5, p5, l5, "class-major")

    print("KERNEL_OK")
</pallas_src>

<mosaic_0001>
module attributes {stable_mosaic.version = 11 : i64} {
  func.func @_ce_partial_kernel(%arg0: i32, %arg1: memref<3x32x128xf32, #tpu.memory_space<vmem>>, %arg2: memref<1x32x128xi8, #tpu.memory_space<vmem>>, %arg3: memref<1x1x128xf32, #tpu.memory_space<vmem>>) attributes {dimension_semantics = [#tpu.dimension_semantics<parallel>], iteration_bounds = array<i64: 2>, scalar_prefetch = 0 : i64, scratch_operands = 0 : i64, tpu.core_type = #tpu.core_type<tc>, window_params = [{transform_indices = @transform_0, window_bounds = array<i64: 3, 32, 128>}, {transform_indices = @transform_1, window_bounds = array<i64: 1, 32, 128>}, {transform_indices = @transform_2, window_bounds = array<i64: 1, 1, 128>}]} {
    %c0 = arith.constant 0 : index
    %c0_0 = arith.constant 0 : index
    %c0_1 = arith.constant 0 : index
    %0 = vector.load %arg1[%c0, %c0_0, %c0_1] : memref<3x32x128xf32, #tpu.memory_space<vmem>>, vector<1x32x128xf32>
    %1 = vector.shape_cast %0 : vector<1x32x128xf32> to vector<32x128xf32>
    %c1 = arith.constant 1 : index
    %c0_2 = arith.constant 0 : index
    %c0_3 = arith.constant 0 : index
    %2 = vector.load %arg1[%c1, %c0_2, %c0_3] : memref<3x32x128xf32, #tpu.memory_space<vmem>>, vector<1x32x128xf32>
    %3 = vector.shape_cast %2 : vector<1x32x128xf32> to vector<32x128xf32>
    %c2 = arith.constant 2 : index
    %c0_4 = arith.constant 0 : index
    %c0_5 = arith.constant 0 : index
    %4 = vector.load %arg1[%c2, %c0_4, %c0_5] : memref<3x32x128xf32, #tpu.memory_space<vmem>>, vector<1x32x128xf32>
    %5 = vector.shape_cast %4 : vector<1x32x128xf32> to vector<32x128xf32>
    %c0_6 = arith.constant 0 : index
    %c0_7 = arith.constant 0 : index
    %c0_8 = arith.constant 0 : index
    %6 = vector.load %arg2[%c0_6, %c0_7, %c0_8] : memref<1x32x128xi8, #tpu.memory_space<vmem>>, vector<1x32x128xi8>
    %7 = vector.shape_cast %6 : vector<1x32x128xi8> to vector<32x128xi8>
    %8 = arith.extsi %7 : vector<32x128xi8> to vector<32x128xi32>
    %9 = arith.maximumf %1, %3 : vector<32x128xf32>
    %10 = arith.maximumf %9, %5 : vector<32x128xf32>
    %11 = arith.subf %1, %10 : vector<32x128xf32>
    %12 = math.exp %11 : vector<32x128xf32>
    %13 = arith.subf %3, %10 : vector<32x128xf32>
    %14 = math.exp %13 : vector<32x128xf32>
    %15 = arith.addf %12, %14 : vector<32x128xf32>
    %16 = arith.subf %5, %10 : vector<32x128xf32>
    %17 = math.exp %16 : vector<32x128xf32>
    %18 = arith.addf %15, %17 : vector<32x128xf32>
    %19 = math.log %18 : vector<32x128xf32>
    %20 = arith.addf %19, %10 : vector<32x128xf32>
    %c0_i32 = arith.constant 0 : i32
    %21 = vector.broadcast %c0_i32 : i32 to vector<32x128xi32>
    %22 = arith.cmpi eq, %8, %21 : vector<32x128xi32>
    %c1_i32 = arith.constant 1 : i32
    %23 = vector.broadcast %c1_i32 : i32 to vector<32x128xi32>
    %24 = arith.cmpi eq, %8, %23 : vector<32x128xi32>
    %25 = arith.select %24, %3, %5 : vector<32x128xi1>, vector<32x128xf32>
    %26 = arith.select %22, %1, %25 : vector<32x128xi1>, vector<32x128xf32>
    %c0_i32_9 = arith.constant 0 : i32
    %27 = vector.broadcast %c0_i32_9 : i32 to vector<32x128xi32>
    %28 = arith.cmpi sge, %8, %27 : vector<32x128xi32>
    %29 = arith.subf %20, %26 : vector<32x128xf32>
    %cst = arith.constant 0.000000e+00 : f32
    %30 = vector.broadcast %cst : f32 to vector<32x128xf32>
    %31 = arith.select %28, %29, %30 : vector<32x128xi1>, vector<32x128xf32>
    %cst_10 = arith.constant dense<0.000000e+00> : vector<128xf32>
    %32 = vector.multi_reduction <add>, %31, %cst_10 [0] : vector<32x128xf32> to vector<128xf32>
    %33 = vector.shape_cast %32 : vector<128xf32> to vector<1x128xf32>
    %34 = vector.shape_cast %33 : vector<1x128xf32> to vector<1x1x128xf32>
    %c0_11 = arith.constant 0 : index
    %c0_12 = arith.constant 0 : index
    %c0_13 = arith.constant 0 : index
    %35 = vector.load %arg3[%c0_11, %c0_12, %c0_13] : memref<1x1x128xf32, #tpu.memory_space<vmem>>, vector<1x1x128xf32>
    tpu.vector_store %arg3[%c0_11, %c0_12, %c0_13], %34 {strides = array<i32>} : memref<1x1x128xf32, #tpu.memory_space<vmem>>, vector<1x1x128xf32>,
    return
  }
  func.func @transform_0(%arg0: i32) -> (i32, i32, i32) {
    %c0_i32 = arith.constant 0 : i32
    %c0_i32_0 = arith.constant 0 : i32
    %c0_i32_1 = arith.constant 0 : i32
    return %c0_i32, %arg0, %c0_i32_0 : i32, i32, i32
  }
  func.func @transform_1(%arg0: i32) -> (i32, i32, i32) {
    %c0_i32 = arith.constant 0 : i32
    %c0_i32_0 = arith.constant 0 : i32
    %c0_i32_1 = arith.constant 0 : i32
    return %arg0, %c0_i32, %c0_i32_0 : i32, i32, i32
  }
  func.func @transform_2(%arg0: i32) -> (i32, i32, i32) {
    %c0_i32 = arith.constant 0 : i32
    %c0_i32_0 = arith.constant 0 : i32
    %c0_i32_1 = arith.constant 0 : i32
    return %arg0, %c0_i32, %c0_i32_0 : i32, i32, i32
  }
}

</mosaic_0001>

<bundles_post_ra>
// kernel: tpu_custom_call.1
= control target key start
LH: loop header
LB: loop body
LE: loop exit
PB: predicated region body
PF: predicated region fallthrough
CT: control target
= control target key end

     0   :  { %7 = vsyncpa [#allocation3], 0  ;;  %s922_s0 = inlined_call_operand.hbm [shape: f32[3,64,128], index: 0, kind: input, shape index: {}]   ;;  %s923_s1 = inlined_call_operand.hbm [shape: s8[2,32,128], index: 1, kind: input, shape index: {}]   ;;  %s924_s2 = inlined_call_operand.hbm [shape: f32[2,1,128], index: 2, kind: output, shape index: {}]  }
   0x1   :  { %9 = vsyncpa [#allocation3 + $0x1], 0 }
   0x2   :  { %10 = vsyncpa [#allocation6], 0 }
   0x3   :  { %12 = vsyncpa [#allocation6 + $0x1], 0 }
   0x4   :  { %13 = vsyncpa [#allocation4], 0 }
   0x5   :  { %15 = vsyncpa [#allocation4 + $0x1], 0  ;;  %s684_s9 = smov 0   ;;  %s686_s10 = smov 0  }
   0x6   :  { %s688_s11 = smov 0   ;;  %s690_s12 = smov 0  }
   0x7 LB: > { %s705_s13 = sadd.s32 4294967295, %s661_s12   ;;  %s451_s14 = sadd.s32 4294967294, %s661_s12   ;;  %s661_s12 = sphi %s690_s12, %s932_s12   ;;  %s657_s11 = sphi %s688_s11, %s931_s11   ;;  %s653_s10 = sphi %s686_s10, %s930_s10   ;;  %s649_s9 = sphi %s684_s9, %s929_s9  }
   0x8   : > { %s709_s15 = sadd.s32 1, %s661_s12   ;;  %s28_s16 = sadd.s32 1, %s657_s11 }
   0x9   : > { %s25_s17 = ssub.s32 %s661_s12, %s709_s15  ;;  %p35_p0 = scmp.ne.s32.totalorder %s657_s11, %s653_s10 }
   0xa   : > { %p26_p1 = scmp.eq.s32.totalorder %s25_s17, 0  ;;  %p36_p2 = scmp.eq.s32.totalorder %s661_s12, 0 }
   0xb   : > { %p41_p3 = scmp.ne.s32.totalorder %s653_s10, %s649_s9  ;;  %p42_p4 = scmp.eq.s32.totalorder %s705_s13, 0 }
   0xc   : > { %s721_s18 = scalar_select %p26_p1, %s657_s11, %s28_s16  }
   0xd   : > { %p723_p5 = por %p36_p2, %p35_p0  ;;  %p727_p6 = por %p42_p4, %p41_p3 }
   0xe   : > { %p91_p7 = scmp.eq.s32.totalorder %s705_s13, 1  ;;  %p97_p8 = scmp.eq.s32.totalorder %s451_s14, 1 }
   0xf   : > { %p453_p11 = scmp.ge.s32.totalorder %s661_s12, 2 }
  0x10   : > { %p732_p9 = por %p91_p7, %p35_p0  ;;  %p736_p10 = por %p97_p8, %p41_p3 }
  0x11   : > { %113 = sbr.rel (%p453_p11) target bundleno = 51 (0x33), region = 16 }
  0x16   : > { %s744_s23 = sand.u32 1, %s657_s11   ;;  %s472_s24 = sshll.u32 %s661_s12, 5 }
  0x17   : > { %s473_s25 = smul.u32 96, %s744_s23  ;;  %s126_s28 = scalar_lea.hbm %s922_s0, %s472_s24 }
  0x18   : > { %s139_s29 = sshll.u32 %s126_s28, 4  ;;  %s663_s6 = smov 1024   ;;  %s140_s29 = int_to_ptr.hbm [resolvable:$true] %s139_s29 }
  0x19   : > { %s475_s30 = scalar_select %p723_p5, [#allocation0], [#allocation10] }
  0x1a   : > { %s121_s3 = scalar_lea.vmem [#allocation2], %s473_s25  ;;  %476 = sst [smem:[#allocation9]] (%p723_p5), %s663_s6 }
  0x1b   : > { %s141_s4 = sshll.u32 %s121_s3, 4  ;;  %s131_s5 = sld [smem:[%s475_s30]]   ;;  %s142_s4 = int_to_ptr.vmem [resolvable:$true] %s141_s4 }
  0x1c   : > { %s664_s7 = smov 512   ;;  %s665_s8 = smov 4  }
  0x1d   : > { %477 = sst [smem:[#allocation9 + $0x1]] (%p723_p5), %s664_s7  ;;  %s666_s14 = smov 128  }
  0x1e   : > { %478 = sst [smem:[#allocation9 + $0x2]] (%p723_p5), %s665_s8  ;;  %s667_s17 = smov 8  }
  0x1f   : > { %479 = sst [smem:[#allocation9 + $0x3]] (%p723_p5), %s666_s14  ;;  %s118_s25 = scalar_lea.sflag [#allocation3], %s744_s23 }
  0x20   : > { %480 = sst [smem:[#allocation9 + $0x4]] (%p723_p5), %s666_s14  ;;  %s668_s26 = smov [#allocation8]  }
  0x21   : > { %s456_s16 = sshll.u32 %s131_s5, 26  ;;  %481 = sst [smem:[#allocation9 + $0x5]] (%p723_p5), %s667_s17 }
  0x22   : > { %s457_s24 = sadd.s32 134217728, %s456_s16  ;;  %s458_s27 = sshll.u32 %s744_s23, 3 }
  0x23   : > { %482 = dma.general (%p723_p5), %s140_s29, 1536, %s142_s4, %s118_s25, %s668_s26, [#allocation9], %s457_s24, 0  }
  0x24   : > { %s459_s28 = sshll.u32 %s661_s12, 3  ;;  %s168_s7 = scalar_lea.vmem [#allocation5], %s458_s27 }
  0x25   : > { %s172_s6 = scalar_lea.hbm %s923_s1, %s459_s28  ;;  %s176_s5 = sshll.u32 %s168_s7, 4  ;;  %s177_s5 = int_to_ptr.vmem [resolvable:$true] %s176_s5 }
  0x26   : > { %s174_s8 = sshll.u32 %s172_s6, 4  ;;  %s165_s14 = scalar_lea.sflag [#allocation6], %s744_s23  ;;  %s175_s8 = int_to_ptr.hbm [resolvable:$true] %s174_s8 }
  0x27   : > { %s563_s16 = sshra.s32 %s175_s8, 4  ;;  %s569_s24 = scalar_lea.hbm %s923_s1, 16  ;;  %s564_s16 = int_to_ptr.hbm [resolvable:$true] %s563_s16 }
  0x28   : > { %s565_s17 = scalar_lea.hbm %s564_s16, 8  ;;  %p570_p1 = scmp.lt.s32.totalorder %s564_s16, %s923_s1 }
  0x29   : > { %p566_p12 = scmp.ne.s32.totalorder %s564_s16, %s565_s17  ;;  %p571_p2 = scmp.lt.s32.totalorder %s569_s24, %s565_s17 }
  0x2b   : > { %p567_p13 = pnand %p566_p12, %p723_p5  ;;  %p572_p3 = por %p571_p2, %p570_p1 }
  0x2d   : > { %p568_p0 = pneg %p567_p13 }
  0x2f   : > { %p573_p4 = pnand %p572_p3, %p568_p0 }
  0x31   : > { %576 = shalt.err (!%p573_p4)
}
  0x32   : > { %483 = dma.hbm_to_vmem [thread:$0]  (%p723_p5), %s175_s8, 128, %s177_s5, %s165_s14  }
  0x33 PF: > { %p460_p7 = scmp.ge.s32.totalorder %s661_s12, 1  ;;  %p181_p8 = scmp.lt.s32.totalorder %s661_s12, 3 }
  0x35   : > { %p182_p12 = pnand %p460_p7, %p181_p8 }
  0x36   : > { %s787_s23 = sand.u32 (!%p182_p12), 1, %s653_s10  }
  0x37   : > { %185 = sbr.rel (%p182_p12) target bundleno = 127 (0x7f), region = 28  ;;  %s188_s28 = scalar_lea.sflag (!%p182_p12), [#allocation3], %s787_s23 }
  0x38   : > { %s474_s27 = smul.u32 (!%p182_p12), 96, %s787_s23 }
  0x3a   : > { %s191_s30 = scalar_lea.vmem (!%p182_p12), [#allocation2], %s474_s27 }
  0x3c   : > { %636 = dma.done.wait (%p727_p6), %s188_s28, 1536  }
  0x3d   : > { %638 = vsyncadd (%p727_p6), %s188_s28, 4294965760  ;;  %s461_s19 = sshll.u32 %s787_s23, 3  ;;  %s198_s3 = scalar_lea.sflag [#allocation6], %s787_s23 }
  0x3e   : > { %s797_s6 = scalar_lea.vmem [#allocation5], %s461_s19 }
  0x3f   : > { %640 = dma.done.wait (%p727_p6), %s198_s3, 128  }
  0x40   : > { %642 = vsyncadd (%p727_p6), %s198_s3, 4294967168  ;;  %v803_v0 = vld [vmem:[%s191_s30] sm:$0xff]  ;;  %v805_v1 = vld [vmem:[%s191_s30 + $0x8] sm:$0xff]  ;;  %s358_s5 = scalar_lea.hbm %s924_s2, %s705_s13  ;;  %s226_s8 = scalar_lea.vmem [#allocation7], %s787_s23 }
  0x41   : > { %v807_v2 = vld [vmem:[%s191_s30 + $0x10] sm:$0xff]  ;;  %v809_v3 = vld [vmem:[%s191_s30 + $0x18] sm:$0xff]  ;;  %v811_v4 = vld [vmem:[%s191_s30 + $0x20] sm:$0xff]  ;;  %s360_s14 = sshll.u32 %s226_s8, 4  ;;  %s362_s16 = sshll.u32 %s358_s5, 4  ;;  %s361_s14 = int_to_ptr.vmem [resolvable:$true] %s360_s14  ;;  %s363_s16 = int_to_ptr.hbm [resolvable:$true] %s362_s16 }
  0x42   : > { %v813_v5 = vld [vmem:[%s191_s30 + $0x28] sm:$0xff]  ;;  %v815_v6 = vld [vmem:[%s191_s30 + $0x30] sm:$0xff]  ;;  %v817_v7 = vld [vmem:[%s191_s30 + $0x38] sm:$0xff]  ;;  %v247_v9 = vmax.f32 %v803_v0, %v811_v4  ;;  %s350_s17 = scalar_lea.sflag [#allocation4], %s787_s23  ;;  %s605_s29 = sshra.s32 %s363_s16, 4  ;;  %s606_s29 = int_to_ptr.hbm [resolvable:$true] %s605_s29 }
  0x43   : > { %v819_v8 = vld [vmem:[%s191_s30 + $0x40] sm:$0xff]  ;;  %v248_v10 = vmax.f32 %v805_v1, %v813_v5  ;;  %v825_v11 = vld [vmem:[%s191_s30 + $0x48] sm:$0xff]  ;;  %v827_v12 = vld [vmem:[%s191_s30 + $0x50] sm:$0xff]  ;;  %v249_v14 = vmax.f32 %v807_v2, %v815_v6  ;;  %v250_v15 = vmax.f32 %v809_v3, %v817_v7  ;;  %s607_s4 = scalar_lea.hbm %s606_s29, 1  ;;  %s611_s13 = scalar_lea.hbm %s924_s2, 2 }
  0x44   : > { %v829_v13 = vld [vmem:[%s191_s30 + $0x58] sm:$0xff]  ;;  %v836_v16 = vmax.f32 %v247_v9, %v819_v8  ;;  %v242_v52 = vld [vmem:[%s797_s6] sm:$0xff]  ;;  %p608_p5 = scmp.ne.s32.totalorder %s606_s29, %s607_s4  ;;  %p612_p0 = scmp.lt.s32.totalorder %s606_s29, %s924_s2 }
  0x45   : > { %v839_v17 = vmax.f32 %v248_v10, %v825_v11  ;;  %v842_v18 = vmax.f32 %v249_v14, %v827_v12  ;;  %v845_v19 = vmax.f32 %v250_v15, %v829_v13  ;;  %v243_v59 = vunpack.c.0.s8 %v242_v52  ;;  %p613_p1 = scmp.lt.s32.totalorder %s611_s13, %s607_s4 }
  0x46   : > { %v255_v20 = vsub.f32 %v803_v0, %v836_v16  ;;  %v267_v22 = vsub.f32 %v811_v4, %v836_v16  ;;  %v283_v30 = vsub.f32 %v819_v8, %v836_v16  ;;  %v244_v62 = vunpack.c.1.s8 %v242_v52  ;;  %p609_p6 = pnand %p608_p5, %p732_p9 }
  0x47   : > { %v256_v21 = vsub.f32 %v805_v1, %v839_v17  ;;  %v268_v23 = vsub.f32 %v813_v5, %v839_v17  ;;  %v257_v24 = vsub.f32 %v807_v2, %v842_v18  ;;  %v258_v25 = vsub.f32 %v809_v3, %v845_v19  ;;  %p614_p2 = por %p613_p1, %p612_p0 }
  0x48   : > { %v259_v26 = vmul.f32 1.442695, %v255_v20  ;;  %v269_v28 = vsub.f32 %v815_v6, %v842_v18  ;;  %v270_v29 = vsub.f32 %v817_v7, %v845_v19  ;;  %v271_v33 = vmul.f32 1.442695, %v267_v22  ;;  %p610_p13 = pneg %p609_p6 }
  0x49   : > { %v261_v27 = vmul.f32 1.442695, %v256_v21  ;;  %v263_v31 = vmul.f32 1.442695, %v257_v24  ;;  %v265_v32 = vmul.f32 1.442695, %v258_v25  ;;  %v284_v35 = vsub.f32 %v825_v11, %v839_v17 }
  0x4a   : > { %531 = vpow2.f32 %v259_v26  ;;  %v273_v34 = vmul.f32 1.442695, %v268_v23  ;;  %v275_v36 = vmul.f32 1.442695, %v269_v28  ;;  %v285_v37 = vsub.f32 %v827_v12, %v842_v18  ;;  %p615_p3 = pnand %p614_p2, %p610_p13 }
  0x4b   : > { %533 = vpow2.f32 %v261_v27  ;;  %v277_v38 = vmul.f32 1.442695, %v270_v29  ;;  %v286_v39 = vsub.f32 %v829_v13, %v845_v19  ;;  %v287_v40 = vmul.f32 1.442695, %v283_v30 }
  0x4c   : > { %535 = vpow2.f32 %v263_v31  ;;  %v289_v41 = vmul.f32 1.442695, %v284_v35  ;;  %v291_v43 = vmul.f32 1.442695, %v285_v37  ;;  %v245_v10 = vunpack.c.2.s8 %v242_v52 }
  0x4d   : > { %537 = vpow2.f32 %v265_v32  ;;  %v293_v45 = vmul.f32 1.442695, %v286_v39  ;;  %v246_v15 = vunpack.c.3.s8 %v242_v52  ;;  %vm315_vm0 = vcmp.eq.s32.totalorder %v243_v59, 1 }
  0x4e   : > { %539 = vpow2.f32 %v271_v33  ;;  %vm316_vm1 = vcmp.eq.s32.totalorder %v244_v62, 1  ;;  %vm317_vm2 = vcmp.eq.s32.totalorder %v245_v10, 1  ;;  %vm311_vm3 = vcmp.eq.s32.totalorder %v243_v59, 0 }
  0x4f   : > { %541 = vpow2.f32 %v273_v34  ;;  %vm318_vm4 = vcmp.eq.s32.totalorder %v246_v15, 1  ;;  %v319_v21 = vsel %vm315_vm0, %v811_v4, %v819_v8  ;;  %vm312_vm5 = vcmp.eq.s32.totalorder %v244_v62, 0 }
  0x50   : > { %v532_v42 = vpop.eup %531  ;;  %543 = vpow2.f32 %v275_v36  ;;  %v320_v23 = vsel %vm316_vm1, %v813_v5, %v825_v11  ;;  %vm313_vm6 = vcmp.eq.s32.totalorder %v245_v10, 0  ;;  %v321_v26 = vsel %vm317_vm2, %v815_v6, %v827_v12 }
  0x51   : > { %v534_v44 = vpop.eup %533  ;;  %545 = vpow2.f32 %v277_v38  ;;  %vm314_vm7 = vcmp.eq.s32.totalorder %v246_v15, 0  ;;  %v322_v29 = vsel %vm318_vm4, %v817_v7, %v829_v13  ;;  %v323_v30 = vsel %vm311_vm3, %v803_v0, %v319_v21 }
  0x52   : > { %v536_v46 = vpop.eup %535  ;;  %547 = vpow2.f32 %v287_v40  ;;  %v324_v5 = vsel %vm312_vm5, %v805_v1, %v320_v23  ;;  %v325_v33 = vsel %vm313_vm6, %v807_v2, %v321_v26  ;;  %vm327_vm8 = vcmp.ge.s32.totalorder %v243_v59, 0 }
  0x53   : > { %v538_v47 = vpop.eup %537  ;;  %549 = vpow2.f32 %v289_v41  ;;  %v326_v12 = vsel %vm314_vm7, %v809_v3, %v322_v29  ;;  %vm328_vm9 = vcmp.ge.s32.totalorder %v244_v62, 0  ;;  %vm329_vm10 = vcmp.ge.s32.totalorder %v245_v10, 0 }
  0x54   : > { %v540_v48 = vpop.eup %539  ;;  %551 = vpow2.f32 %v291_v43  ;;  %vm330_vm11 = vcmp.ge.s32.totalorder %v246_v15, 0 }
  0x55   : > { %v542_v49 = vpop.eup %541  ;;  %v279_v50 = vadd.f32 %v540_v48, %v532_v42  ;;  %553 = vpow2.f32 %v293_v45 }
  0x56   : > { %v544_v51 = vpop.eup %543  ;;  %v280_v53 = vadd.f32 %v542_v49, %v534_v44 }
  0x57   : > { %v546_v54 = vpop.eup %545  ;;  %v281_v55 = vadd.f32 %v544_v51, %v536_v46 }
  0x58   : > { %v548_v56 = vpop.eup %547  ;;  %v282_v57 = vadd.f32 %v546_v54, %v538_v47 }
  0x59   : > { %v550_v58 = vpop.eup %549  ;;  %v295_v60 = vadd.f32 %v548_v56, %v279_v50 }
  0x5a   : > { %v552_v61 = vpop.eup %551  ;;  %v296_v63 = vadd.f32 %v550_v58, %v280_v53 }
  0x5b   : > { %v554_v9 = vpop.eup %553  ;;  %v297_v14 = vadd.f32 %v552_v61, %v281_v55  ;;  %555 = vlog2.f32 %v295_v60 }
  0x5c   : > { %v298_v20 = vadd.f32 %v554_v9, %v282_v57  ;;  %557 = vlog2.f32 %v296_v63 }
  0x5d   : > { %559 = vlog2.f32 %v297_v14 }
  0x5e   : > { %561 = vlog2.f32 %v298_v20 }
  0x61   : > { %v556_v22 = vpop.eup %555 }
  0x62   : > { %v558_v24 = vpop.eup %557  ;;  %v300_v25 = vmul.f32 0.6931472, %v556_v22 }
  0x63   : > { %v560_v27 = vpop.eup %559  ;;  %v302_v28 = vmul.f32 0.6931472, %v558_v24 }
  0x64   : > { %v562_v4 = vpop.eup %561  ;;  %v304_v8 = vmul.f32 0.6931472, %v560_v27  ;;  %v307_v31 = vadd.f32 %v300_v25, %v836_v16 }
  0x65   : > { %v306_v11 = vmul.f32 0.6931472, %v562_v4  ;;  %v308_v32 = vadd.f32 %v302_v28, %v839_v17 }
  0x66   : > { %v309_v6 = vadd.f32 %v304_v8, %v842_v18  ;;  %v331_v7 = vsub.f32 %v307_v31, %v323_v30 }
  0x67   : > { %v310_v0 = vadd.f32 %v306_v11, %v845_v19  ;;  %v332_v13 = vsub.f32 %v308_v32, %v324_v5 }
  0x68   : > { %v333_v1 = vsub.f32 %v309_v6, %v325_v33  ;;  %v335_v16 = vsel %vm327_vm8, %v331_v7, 0.0 }
  0x69   : > { %v334_v34 = vsub.f32 %v310_v0, %v326_v12  ;;  %v336_v17 = vsel %vm328_vm9, %v332_v13, 0.0 }
  0x6a   : > { %v337_v35 = vsel %vm329_vm10, %v333_v1, 0.0  ;;  %v339_v2 = vadd.f32 %v336_v17, %v335_v16 }
  0x6b   : > { %v338_v36 = vsel %vm330_vm11, %v334_v34, 0.0 }
  0x6c   : > { %v340_v18 = vadd.f32 %v339_v2, %v337_v35 }
  0x6e   : > { %v341_v37 = vadd.f32 %v340_v18, %v338_v36 }
  0x70   : > { %v342_v3 = vrot.slane %v341_v37, 4 }
  0x72   : > { %v343_v38 = vadd.f32 %v342_v3, %v341_v37 }
  0x74   : > { %v344_v39 = vrot.slane %v343_v38, 2 }
  0x76   : > { %v345_v19 = vadd.f32 %v344_v39, %v343_v38 }
  0x78   : > { %v346_v40 = vrot.slane %v345_v19, 1 }
  0x7a   : > { %v347_v41 = vadd.f32 %v346_v40, %v345_v19 }
  0x7c   : > { %348 = vst [vmem:[%s226_s8] sm:$0x1] %v347_v41 }
  0x7d   : > { %618 = shalt.err (!%p615_p3)
}
  0x7e   : > { %486 = dma.vmem_to_hbm [thread:$0]  (%p732_p9), %s361_s14, 16, %s363_s16, %s350_s17  }
  0x7f PF: > { %s374_s23 = sand.u32 1, %s649_s9   ;;  %p489_p4 = pnand %p453_p11, %p736_p10 }
  0x80   : > { %s375_s28 = scalar_lea.sflag [#allocation4], %s374_s23 }
  0x81   : > { %p490_p7 = pneg %p489_p4 }
  0x83   : > { %644 = dma.done.wait (%p490_p7), %s375_s28, 16  }
  0x84   : > { %646 = vsyncadd (%p490_p7), %s375_s28, 4294967280  ;;  %p18_p8 = scmp.ge.s32.totalorder %s709_s15, 4   ;;  %s929_s9 = smov %s653_s10 }
  0x85   : > { %s930_s10 = smov %s657_s11  ;;  %s931_s11 = smov %s721_s18 }
  0x86   : > { %s932_s12 = smov %s709_s15  ;;  %20 = sbr.rel (!%p18_p8) target bundleno = 7 (0x7), region = 93 }
  0x8b   :  { %380 = vsyncpa [#allocation3], 1 }
  0x8c   :  { %382 = vsyncpa [#allocation3 + $0x1], 1 }
  0x8d   :  { %383 = vsyncpa [#allocation6], 1 }
  0x8e   :  { %385 = vsyncpa [#allocation6 + $0x1], 1 }
  0x8f   :  { %386 = vsyncpa [#allocation4], 1 }
  0x90   :  { %388 = vsyncpa [#allocation4 + $0x1], 1 }

</bundles_post_ra>
